<compile_context>
chip_gen: v7x
topology: tpu7x:2x2x1
jax: 0.10.0
libtpu: 0.0.40
codegen_flags: <defaults>
</compile_context>

<pallas_src>
import functools
import math

import jax
import jax.numpy as jnp
from jax.experimental import pallas as pl
from jax.experimental.pallas import tpu as pltpu

_PREC = jax.lax.Precision.HIGHEST   # f32-accurate MXU passes (needed for atol=1e-5)
_TB_MAX = 4096                      # batch-tile cap (lanes), multiple of 128


def _mlp_kernel(x_ref, w_ref, b_ref, out_ref, *, dims):
    """One batch tile of the whole MLP, in (features, batch) layout.

    x_ref  : (In, TB)            activations, batch on lanes (lane-dense)
    w_ref  : (L, Nmax, Kmax)     w_ref[l] = PyTorch W_l (out, in), zero padded
    b_ref  : (L, Nmax, 1)        b_ref[l, n, 0] = b_l[n]
    out_ref: (Out, TB)
    """
    n_layers = len(dims) - 1
    h = x_ref[...]                                        # (K0, TB)

    for li in range(n_layers):
        K, N = dims[li], dims[li + 1]
        w = w_ref[li, :N, :K]                             # (N, K), static slice
        acc = jnp.dot(w, h, precision=_PREC,
                      preferred_element_type=jnp.float32)  # (N, TB) on the MXU
        acc = acc + b_ref[li, :N, :]                      # bias broadcast over lanes
        h = jnp.tanh(acc) if li < n_layers - 1 else acc   # hidden: Tanh (EUP); last: none

    out_ref[...] = h.astype(out_ref.dtype)


def pack_params(params, input_dim):
    """Pack PyTorch-layout (out,in) weights / biases ONCE into two fused buffers."""
    dims = tuple([input_dim] + [w.shape[0] for (w, _) in params])
    L = len(params)
    k_max = max(dims[:-1])
    n_max = max(dims[1:])
    w_all = jnp.zeros((L, n_max, k_max), jnp.float32)
    b_all = jnp.zeros((L, n_max, 1), jnp.float32)
    for l, (w, b) in enumerate(params):
        n, k = w.shape
        w_all = w_all.at[l, :n, :k].set(w.astype(jnp.float32))
        b_all = b_all.at[l, :n, 0].set(b.astype(jnp.float32))
    return w_all, b_all, dims


@functools.partial(jax.jit, static_argnames=("dims", "tb"))
def nn_forward(x, w_all, b_all, *, dims, tb=None):
    """x: (B, Input_Dim) f32 -> (B, Output_Dim) f32 (NN.forward, Batch_Norm=False)."""
    B = x.shape[0]
    in_dim, out_dim = dims[0], dims[-1]

    # Batch tile: as fat as possible (amortizes per-grid-step overhead) but aim
    # for >= 2 grid steps when B permits so v7x can shard across both TCs.
    if tb is None:
        half = -(-B // 2)                                  # cdiv(B, 2)
        tb = min(_TB_MAX, max(128, ((half + 127) // 128) * 128))
    b_pad = pl.cdiv(B, tb) * tb

    # (features, batch) layout, batch zero-padded to a tile multiple.
    x_t = jnp.zeros((in_dim, b_pad), jnp.float32).at[:, :B].set(x.T)

    grid = (b_pad // tb,)
    kernel = functools.partial(_mlp_kernel, dims=dims)

    out_t = pl.pallas_call(
        kernel,
        out_shape=jax.ShapeDtypeStruct((out_dim, b_pad), jnp.float32),
        grid=grid,
        in_specs=[
            pl.BlockSpec((in_dim, tb), lambda i: (0, i)),      # activations: tiled over batch
            pl.BlockSpec(w_all.shape, lambda i: (0, 0, 0)),    # weights: VMEM-resident
            pl.BlockSpec(b_all.shape, lambda i: (0, 0, 0)),    # biases:  VMEM-resident
        ],
        out_specs=pl.BlockSpec((out_dim, tb), lambda i: (0, i)),
        compiler_params=pltpu.CompilerParams(
            dimension_semantics=("parallel",),    # megacore-shard batch tiles (v7x)
            vmem_limit_bytes=32 * 1024 * 1024,    # plenty of headroom on v5e/v6e/v7x
        ),
    )(x_t, w_all, b_all)

    # back to (B, Output_Dim), dropping batch padding
    return out_t[:, :B].T


def init_params(key,
                num_hidden_layers=3,
                neurons_per_layer=20,
                input_dim=1,
                output_dim=1):
    """xavier_normal(gain=5/3) weights (PyTorch (out, in) layout), zero biases."""
    gain = 5.0 / 3.0
    dims = [input_dim] + [neurons_per_layer] * num_hidden_layers + [output_dim]
    params = []
    for i in range(num_hidden_layers + 1):
        fan_in, fan_out = dims[i], dims[i + 1]
        std = gain * math.sqrt(2.0 / (fan_in + fan_out))
        key, sub = jax.random.split(key)
        w = std * jax.random.normal(sub, (fan_out, fan_in), dtype=jnp.float32)
        b = jnp.zeros((fan_out,), dtype=jnp.float32)
        params.append((w, b))
    return params


def reference_forward(x, params):
    """Pure-JAX reference matching F.linear semantics: x @ W.T + b."""
    h = x
    for (w, b) in params[:-1]:
        h = jnp.tanh(h @ w.T + b)
    w, b = params[-1]
    return h @ w.T + b


if __name__ == "__main__":
    key = jax.random.PRNGKey(0)
    key, kx, kx2 = jax.random.split(key, 3)

    # Module defaults: Input_Dim=1, Neurons_Per_Layer=20, Output_Dim=1, 3 hidden layers.
    B, INPUT_DIM, HIDDEN, OUTPUT_DIM, N_HIDDEN = 8, 1, 20, 1, 3

    params = init_params(key, N_HIDDEN, HIDDEN, INPUT_DIM, OUTPUT_DIM)
    w_all, b_all, dims = pack_params(params, INPUT_DIM)   # packed once, reused per call

    # Small batch (single grid step).
    x = jax.random.normal(kx, (B, INPUT_DIM), dtype=jnp.float32)
    out = jax.block_until_ready(nn_forward(x, w_all, b_all, dims=dims))
    ref = reference_forward(x, params)
    assert out.shape == (B, OUTPUT_DIM), out.shape
    assert jnp.allclose(out, ref, atol=1e-5, rtol=1e-4), (out, ref)

    # Larger batch: exercises padding + a 2-step grid (parallel across v7x cores).
    B2 = 300
    x2 = jax.random.normal(kx2, (B2, INPUT_DIM), dtype=jnp.float32)
    out2 = jax.block_until_ready(nn_forward(x2, w_all, b_all, dims=dims))
    ref2 = reference_forward(x2, params)
    assert out2.shape == (B2, OUTPUT_DIM), out2.shape
    assert jnp.allclose(out2, ref2, atol=1e-5, rtol=1e-4)

    print("KERNEL_OK")
</pallas_src>

<mosaic_0001>
module attributes {stable_mosaic.version = 11 : i64} {
  func.func @_mlp_kernel(%arg0: i32, %arg1: memref<1x128xf32, #tpu.memory_space<vmem>>, %arg2: memref<4x20x20xf32, #tpu.memory_space<vmem>>, %arg3: memref<4x20x1xf32, #tpu.memory_space<vmem>>, %arg4: memref<1x128xf32, #tpu.memory_space<vmem>>) attributes {dimension_semantics = [#tpu.dimension_semantics<parallel>], iteration_bounds = array<i64: 1>, scalar_prefetch = 0 : i64, scratch_operands = 0 : i64, tpu.core_type = #tpu.core_type<tc>, window_params = [{transform_indices = @transform_0, window_bounds = array<i64: 1, 128>}, {pipeline_mode = #tpu.pipeline_mode<synchronous>, transform_indices = @transform_1, window_bounds = array<i64: 4, 20, 20>}, {pipeline_mode = #tpu.pipeline_mode<synchronous>, transform_indices = @transform_2, window_bounds = array<i64: 4, 20, 1>}, {transform_indices = @transform_3, window_bounds = array<i64: 1, 128>}]} {
    %c0 = arith.constant 0 : index
    %c0_0 = arith.constant 0 : index
    %0 = vector.load %arg1[%c0, %c0_0] : memref<1x128xf32, #tpu.memory_space<vmem>>, vector<1x128xf32>
    %c0_1 = arith.constant 0 : index
    %c0_2 = arith.constant 0 : index
    %c0_3 = arith.constant 0 : index
    %1 = vector.load %arg2[%c0_1, %c0_2, %c0_3] : memref<4x20x20xf32, #tpu.memory_space<vmem>>, vector<1x20x1xf32>
    %2 = vector.shape_cast %1 : vector<1x20x1xf32> to vector<20x1xf32>
    %cst = arith.constant dense<0.000000e+00> : vector<20x128xf32>
    %3 = tpu.matmul %2, %0, %cst {dimension_numbers = #tpu.dot_dimension_numbers<[1], [0], [0], [1], [0, 0, 1, 1], [], []>, precision = #tpu.contract_precision<fp32>} : vector<20x1xf32>, vector<1x128xf32>, vector<20x128xf32> -> vector<20x128xf32>
    %c0_4 = arith.constant 0 : index
    %c0_5 = arith.constant 0 : index
    %c0_6 = arith.constant 0 : index
    %4 = vector.load %arg3[%c0_4, %c0_5, %c0_6] : memref<4x20x1xf32, #tpu.memory_space<vmem>>, vector<1x20x1xf32>
    %5 = vector.shape_cast %4 : vector<1x20x1xf32> to vector<20x1xf32>
    %6 = vector.broadcast %5 : vector<20x1xf32> to vector<20x128xf32>
    %7 = arith.addf %3, %6 : vector<20x128xf32>
    %8 = math.tanh %7 : vector<20x128xf32>
    %c1 = arith.constant 1 : index
    %c0_7 = arith.constant 0 : index
    %c0_8 = arith.constant 0 : index
    %9 = vector.load %arg2[%c1, %c0_7, %c0_8] : memref<4x20x20xf32, #tpu.memory_space<vmem>>, vector<1x20x20xf32>
    %10 = vector.shape_cast %9 : vector<1x20x20xf32> to vector<20x20xf32>
    %cst_9 = arith.constant dense<0.000000e+00> : vector<20x128xf32>
    %11 = tpu.matmul %10, %8, %cst_9 {dimension_numbers = #tpu.dot_dimension_numbers<[1], [0], [0], [1], [0, 0, 1, 1], [], []>, precision = #tpu.contract_precision<fp32>} : vector<20x20xf32>, vector<20x128xf32>, vector<20x128xf32> -> vector<20x128xf32>
    %c1_10 = arith.constant 1 : index
    %c0_11 = arith.constant 0 : index
    %c0_12 = arith.constant 0 : index
    %12 = vector.load %arg3[%c1_10, %c0_11, %c0_12] : memref<4x20x1xf32, #tpu.memory_space<vmem>>, vector<1x20x1xf32>
    %13 = vector.shape_cast %12 : vector<1x20x1xf32> to vector<20x1xf32>
    %14 = vector.broadcast %13 : vector<20x1xf32> to vector<20x128xf32>
    %15 = arith.addf %11, %14 : vector<20x128xf32>
    %16 = math.tanh %15 : vector<20x128xf32>
    %c2 = arith.constant 2 : index
    %c0_13 = arith.constant 0 : index
    %c0_14 = arith.constant 0 : index
    %17 = vector.load %arg2[%c2, %c0_13, %c0_14] : memref<4x20x20xf32, #tpu.memory_space<vmem>>, vector<1x20x20xf32>
    %18 = vector.shape_cast %17 : vector<1x20x20xf32> to vector<20x20xf32>
    %cst_15 = arith.constant dense<0.000000e+00> : vector<20x128xf32>
    %19 = tpu.matmul %18, %16, %cst_15 {dimension_numbers = #tpu.dot_dimension_numbers<[1], [0], [0], [1], [0, 0, 1, 1], [], []>, precision = #tpu.contract_precision<fp32>} : vector<20x20xf32>, vector<20x128xf32>, vector<20x128xf32> -> vector<20x128xf32>
    %c2_16 = arith.constant 2 : index
    %c0_17 = arith.constant 0 : index
    %c0_18 = arith.constant 0 : index
    %20 = vector.load %arg3[%c2_16, %c0_17, %c0_18] : memref<4x20x1xf32, #tpu.memory_space<vmem>>, vector<1x20x1xf32>
    %21 = vector.shape_cast %20 : vector<1x20x1xf32> to vector<20x1xf32>
    %22 = vector.broadcast %21 : vector<20x1xf32> to vector<20x128xf32>
    %23 = arith.addf %19, %22 : vector<20x128xf32>
    %24 = math.tanh %23 : vector<20x128xf32>
    %c3 = arith.constant 3 : index
    %c0_19 = arith.constant 0 : index
    %c0_20 = arith.constant 0 : index
    %25 = vector.load %arg2[%c3, %c0_19, %c0_20] : memref<4x20x20xf32, #tpu.memory_space<vmem>>, vector<1x1x20xf32>
    %26 = vector.shape_cast %25 : vector<1x1x20xf32> to vector<1x20xf32>
    %cst_21 = arith.constant dense<0.000000e+00> : vector<1x128xf32>
    %27 = tpu.matmul %26, %24, %cst_21 {dimension_numbers = #tpu.dot_dimension_numbers<[1], [0], [0], [1], [0, 0, 1, 1], [], []>, precision = #tpu.contract_precision<fp32>} : vector<1x20xf32>, vector<20x128xf32>, vector<1x128xf32> -> vector<1x128xf32>
    %c3_22 = arith.constant 3 : index
    %c0_23 = arith.constant 0 : index
    %c0_24 = arith.constant 0 : index
    %28 = vector.load %arg3[%c3_22, %c0_23, %c0_24] : memref<4x20x1xf32, #tpu.memory_space<vmem>>, vector<1x1x1xf32>
    %29 = vector.shape_cast %28 : vector<1x1x1xf32> to vector<1x1xf32>
    %30 = vector.broadcast %29 : vector<1x1xf32> to vector<1x128xf32>
    %31 = arith.addf %27, %30 : vector<1x128xf32>
    %c0_25 = arith.constant 0 : index
    %c0_26 = arith.constant 0 : index
    %32 = vector.load %arg4[%c0_25, %c0_26] : memref<1x128xf32, #tpu.memory_space<vmem>>, vector<1x128xf32>
    tpu.vector_store %arg4[%c0_25, %c0_26], %31 {strides = array<i32>} : memref<1x128xf32, #tpu.memory_space<vmem>>, vector<1x128xf32>,
    return
  }
  func.func @transform_0(%arg0: i32) -> (i32, i32) {
    %c0_i32 = arith.constant 0 : i32
    %c0_i32_0 = arith.constant 0 : i32
    return %c0_i32, %arg0 : i32, i32
  }
  func.func @transform_1(%arg0: i32) -> (i32, i32, i32) {
    %c0_i32 = arith.constant 0 : i32
    %c0_i32_0 = arith.constant 0 : i32
    %c0_i32_1 = arith.constant 0 : i32
    %c0_i32_2 = arith.constant 0 : i32
    return %c0_i32, %c0_i32_0, %c0_i32_1 : i32, i32, i32
  }
  func.func @transform_2(%arg0: i32) -> (i32, i32, i32) {
    %c0_i32 = arith.constant 0 : i32
    %c0_i32_0 = arith.constant 0 : i32
    %c0_i32_1 = arith.constant 0 : i32
    %c0_i32_2 = arith.constant 0 : i32
    return %c0_i32, %c0_i32_0, %c0_i32_1 : i32, i32, i32
  }
  func.func @transform_3(%arg0: i32) -> (i32, i32) {
    %c0_i32 = arith.constant 0 : i32
    %c0_i32_0 = arith.constant 0 : i32
    return %c0_i32, %arg0 : i32, i32
  }
}

</mosaic_0001>

<bundles_post_ra>
// kernel: nn_forward.1
= control target key start
LH: loop header
LB: loop body
LE: loop exit
PB: predicated region body
PF: predicated region fallthrough
CT: control target
= control target key end

     0   :  { %vm46_vm0 = vcmask 1040384   ;;  %vm36_vm1 = vcmask 7168   ;;  %v2892_v0 = vmov 0.0   ;;  %vm2893_vm2 = vmmov 0   ;;  %s3272_s0 = inlined_call_operand.vmem [shape: f32[1,128], index: 0, kind: input, shape index: {}]   ;;  %s3273_s1 = inlined_call_operand.vmem [shape: f32[4,20,20], index: 1, kind: input, shape index: {}]   ;;  %s3274_s2 = inlined_call_operand.vmem [shape: f32[4,20,1], index: 2, kind: input, shape index: {}]   ;;  %s3275_s3 = inlined_call_operand.vmem [shape: f32[1,128], index: 3, kind: output, shape index: {}]  }
   0x1   :  { %2416 = vmatprep.subr.mxu0 %v2892_v0  ;;  %v14_v1 = vld [vmem:[%s3272_s0] sm:$0x1]  ;;  %2418 = vmatprep.mubr.msk.f32.mxu0 %vm2893_vm2, %v2892_v0  ;;  %v16_v3 = vld [vmem:[%s3273_s1 + $0x8] sm:$0xff]  ;;  %v17_v7 = vld [vmem:[%s3273_s1 + $0x10] sm:$0xf]  ;;  %v2894_v13 = vmov 0  }
   0x2   :  { %v15_v2 = vld [vmem:[%s3273_s1] sm:$0xff]  ;;  %v48_v4 = vsel %vm46_vm0, %v14_v1, 0  ;;  %v41_v6 = vsel %vm36_vm1, %v16_v3, 0  ;;  %2405 = vmatprep.subr.mxu1 %v2892_v0  ;;  %2407 = vmatprep.mubr.msk.f32.mxu1 %vm2893_vm2, %v2892_v0  ;;  %v44_v12 = vsel %vm36_vm1, %v17_v7, 0  ;;  %v20_v15 = vld [vmem:[%s3274_s2 + $0x10] sm:$0xf] }
   0x3   :  { %v38_v5 = vsel %vm36_vm1, %v15_v2, 0  ;;  %v18_v8 = vld [vmem:[%s3274_s2] sm:$0xff]  ;;  %v2939_v9 = vand.u32 4294901760, %v48_v4  ;;  %v2943_v11 = vand.u32 4294901760, %v41_v6  ;;  %2872 = vset.pattern.permute.xlu0 %v2894_v13  ;;  %2873 = vset.pattern.permute.xlu1 %v2894_v13  ;;  %v2946_v14 = vand.u32 4294901760, %v44_v12  ;;  %v19_v19 = vld [vmem:[%s3274_s2 + $0x8] sm:$0xff] }
   0x4   :  { %v2941_v10 = vand.u32 4294901760, %v38_v5  ;;  %23 = vperm.xlu0 %2872, %v18_v8   ;;  %33 = vperm.xlu1 %2873, %v20_v15   ;;  %v2274_v20 = vld [vmem:[%s3274_s2 + $0x18] sm:$0xff]  ;;  %v2275_v29 = vld [vmem:[%s3274_s2 + $0x20] sm:$0xff]  ;;  %v2280_v34 = vld [vmem:[%s3274_s2 + $0x30] sm:$0xff]  ;;  %v2895_v40 = vmov 0.0|0.0   ;;  %vm608_vm3 = vcmask 162816  }
   0x5   :  { %v148_v16 = vsub.f32 %v48_v4, %v2939_v9  ;;  %v127_v18 = vsub.f32 %v41_v6, %v2943_v11  ;;  %2406 = vmatpush3.msra.mxu1 %v2939_v9  ;;  %v137_v22 = vsub.f32 %v44_v12, %v2946_v14  ;;  %v2276_v35 = vld [vmem:[%s3274_s2 + $0x28] sm:$0xf]  ;;  %v2282_v37 = vld [vmem:[%s3274_s2 + $0x40] sm:$0xf]  ;;  %v2281_v38 = vld [vmem:[%s3274_s2 + $0x38] sm:$0xff]  ;;  %vm618_vm4 = vcmask 1043456  }
   0x6   :  { %v117_v17 = vsub.f32 %v38_v5, %v2941_v10  ;;  %2759 = vmatprep.subr.mxu1 %v2892_v0  ;;  %v2284_v39 = vld [vmem:[%s3274_s2 + $0x48] sm:$0x1]  ;;  %v2271_v52 = vld [vmem:[%s3273_s1 + $0x18] sm:$0xff]  ;;  %v2272_v59 = vld [vmem:[%s3273_s1 + $0x20] sm:$0xff] }
   0x7   :  { %v149_v21 = vand.u32 4294901760, %v148_v16  ;;  %v128_v24 = vand.u32 4294901760, %v127_v18  ;;  %v138_v27 = vand.u32 4294901760, %v137_v22  ;;  %v610_v56 = vsel %vm608_vm3, %v2271_v52, 0  ;;  %v2273_v4 = vld [vmem:[%s3273_s1 + $0x28] sm:$0xf] }
   0x8   :  { %v118_v23 = vand.u32 4294901760, %v117_v17  ;;  %28 = vperm.xlu0 %2872, %v19_v19   ;;  %595 = vperm.xlu1 %2873, %v2274_v20   ;;  %v3041_v62 = vand.u32 4294901760, %v610_v56  ;;  %v613_v1 = vsel %vm608_vm3, %v2272_v59, 0  ;;  %v616_v7 = vsel %vm608_vm3, %v2273_v4, 0 }
   0x9   :  { %v150_v25 = vsub.f32 %v148_v16, %v149_v21  ;;  %v129_v28 = vsub.f32 %v127_v18, %v128_v24  ;;  %v139_v33 = vsub.f32 %v137_v22, %v138_v27  ;;  %v3050_v6 = vand.u32 4294901760, %v613_v1 }
   0xa   :  { %v119_v26 = vsub.f32 %v117_v17, %v118_v23  ;;  %v3048_v5 = vsub.f32 %v610_v56, %v3041_v62  ;;  %v3057_v12 = vand.u32 4294901760, %v616_v7 }
   0xb   :  { %v151_v30 = vand.u32 4294901760, %v150_v25  ;;  %v130_v32 = vand.u32 4294901760, %v129_v28  ;;  %v140_v36 = vand.u32 4294901760, %v139_v33 }
   0xc   :  { %v120_v31 = vand.u32 4294901760, %v119_v26  ;;  %600 = vperm.xlu0 %2872, %v2275_v29   ;;  %605 = vperm.xlu1 %2873, %v2276_v35   ;;  %v3064_v19 = vsub.f32 %v616_v7, %v3057_v12 }
   0xd   :  { %2417 = vmatpush3.msra.mxu0 %v151_v30 }
   0xe   :  { %2408 = vmatmul.mubr.f32.vlgmr.msra.gmra.mrb[0].mxu1 %v120_v31  ;;  %2419 = vmatmul.mubr.f32.vlgmr.msra.gmra.mrb[0].mxu0 %v2941_v10 }
   0xf   :  { %2427 = vmatprep.subr.mxu0 %v2892_v0  ;;  %2429 = vmatprep.mubr.msk.f32.mxu0 %vm2893_vm2, %v2892_v0 }
  0x10   :  { %2428 = vmatpush3.msra.mxu0 %v148_v16  ;;  %2410 = vmatprep.mubr.msk.f32.mxu1 %vm2893_vm2, %v2892_v0 }
  0x11   :  { %2438 = vmatprep.subr.mxu0 %v2892_v0  ;;  %1193 = vperm.xlu0 %2872, %v2280_v34  }
  0x12   :  { %2411 = vmatmul.mubr.f32.gmra.mrb[2].mxu1 %v130_v32  ;;  %1198 = vperm.xlu1 %2873, %v2281_v38  }
  0x13   :  { %2413 = vmatprep.mubr.msk.f32.mxu1 %vm2893_vm2, %v2892_v0  ;;  %2760 = vmatpush3.msra.mxu1 %v151_v30  ;;  %v712_v30 = vand.u32 4294901760, %v3064_v19 }
  0x14   :  { %2705 = vmatprep.subr.bf16.mxu1 %v2895_v40 }
  0x15   :  { %1203 = vperm.xlu0 %2872, %v2282_v37   ;;  %v713_v38 = vsub.f32 %v3064_v19, %v712_v30 }
  0x16   :  { %2414 = vmatmul.mubr.f32.gmra.mrb[4].mxu1 %v140_v36  ;;  %2430 = vmatmul.mubr.f32.vlgmr.msra.gmra.mrb[0].mxu0 %v117_v17 }
  0x17   :  { %2421 = vmatprep.mubr.msk.f32.mxu1 %vm2893_vm2, %v2892_v0  ;;  %2432 = vmatprep.mubr.msk.f32.mxu0 %vm2893_vm2, %v2892_v0 }
  0x18   :  { %2439 = vmatpush3.msra.mxu0 %v2939_v9  ;;  %1785 = vperm.xlu1 %2873, %v2284_v39  }
  0x19   :  { %2449 = vmatprep.subr.mxu0 %v2892_v0 }
  0x1a   :  { %2422 = vmatmul.mubr.f32.vlgmr.msra.gmra.mrb[2].mxu1 %v2943_v11  ;;  %2433 = vmatmul.mubr.f32.gmra.mrb[2].mxu0 %v127_v18 }
  0x1b   :  { %2424 = vmatprep.mubr.msk.f32.mxu1 %vm2893_vm2, %v2892_v0  ;;  %2435 = vmatprep.mubr.msk.f32.mxu0 %vm2893_vm2, %v2892_v0 }
  0x1e   :  { %2425 = vmatmul.mubr.f32.gmra.mrb[4].mxu1 %v2946_v14  ;;  %2436 = vmatmul.mubr.f32.gmra.mrb[4].mxu0 %v137_v22 }
  0x1f   :  { %2477 = vmatprep.mubr.msk.f32.mxu1 %vm2893_vm2, %v2892_v0  ;;  %2440 = vmatprep.mubr.msk.f32.mxu0 %vm2893_vm2, %v2892_v0 }
  0x22   :  { %2441 = vmatmul.mubr.f32.vlgmr.msra.gmra.mrb[0].mxu0 %v118_v23 }
  0x23   :  { %2443 = vmatprep.mubr.msk.f32.mxu0 %vm2893_vm2, %v2892_v0  ;;  %2450 = vmatpush3.msra.mxu0 %v149_v21 }
  0x24   :  { %2460 = vmatprep.subr.mxu0 %v2892_v0 }
  0x26   :  { %2444 = vmatmul.mubr.f32.gmra.mrb[2].mxu0 %v128_v24 }
  0x27   :  { %2446 = vmatprep.mubr.msk.f32.mxu0 %vm2893_vm2, %v2892_v0 }
  0x2a   :  { %2447 = vmatmul.mubr.f32.gmra.mrb[4].mxu0 %v138_v27 }
  0x2b   :  { %2451 = vmatprep.mubr.msk.f32.mxu0 %vm2893_vm2, %v2892_v0 }
  0x2e   :  { %2452 = vmatmul.mubr.f32.vlgmr.msra.gmra.mrb[0].mxu0 %v2941_v10 }
  0x2f   :  { %2454 = vmatprep.mubr.msk.f32.mxu0 %vm2893_vm2, %v2892_v0  ;;  %2461 = vmatpush3.msra.mxu0 %v2939_v9 }
  0x30   :  { %2723 = vmatprep.subr.bf16.mxu0 %v2895_v40 }
  0x32   :  { %2455 = vmatmul.mubr.f32.gmra.mrb[2].mxu0 %v2943_v11 }
  0x33   :  { %2457 = vmatprep.mubr.msk.f32.mxu0 %vm2893_vm2, %v2892_v0 }
  0x36   :  { %2458 = vmatmul.mubr.f32.gmra.mrb[4].mxu0 %v2946_v14 }
  0x37   :  { %2462 = vmatprep.mubr.msk.f32.mxu0 %vm2893_vm2, %v2892_v0 }
  0x3a   :  { %2463 = vmatmul.mubr.f32.vlgmr.msra.gmra.mrb[0].mxu0 %v2941_v10  ;;  %v692_v10 = vand.u32 4294901760, %v3048_v5 }
  0x3b   :  { %2465 = vmatprep.mubr.msk.f32.mxu0 %vm2893_vm2, %v2892_v0 }
  0x3c   :  { %v693_v17 = vsub.f32 %v3048_v5, %v692_v10 }
  0x3e   :  { %2466 = vmatmul.mubr.f32.gmra.mrb[2].mxu0 %v2943_v11  ;;  %v3055_v11 = vsub.f32 %v613_v1, %v3050_v6  ;;  %v694_v28 = vand.u32 4294901760, %v693_v17 }
  0x3f   :  { %2468 = vmatprep.mubr.msk.f32.mxu0 %vm2893_vm2, %v2892_v0 }
  0x40   :  { %v702_v18 = vand.u32 4294901760, %v3055_v11 }
  0x42   :  { %2469 = vmatmul.mubr.f32.gmra.mrb[4].mxu0 %v2946_v14  ;;  %v703_v29 = vsub.f32 %v3055_v11, %v702_v18 }
  0x43   :  { %2567 = vmatprep.mubr.msk.f32.mxu0 %vm2893_vm2, %v2892_v0 }
  0x44   :  { %v704_v36 = vand.u32 4294901760, %v703_v29 }
  0x83   :  { %v24_v47 = vpop.permute.xlu0 %23  ;;  %v34_v60 = vpop.permute.xlu1 %33 }
  0x87   :  { %v29_v53 = vpop.permute.xlu0 %28 }
  0xe1   :  { %v122_v41 = vpop.f32.mrb[0].mxu1 }
  0xe2   :  { %v2409_v42 = vpop.f32.mrb[1].mxu1  ;;  %v123_v48 = vadd.f32 %v122_v41, %v24_v47 }
  0xed   :  { %v224_v43 = vpop.f32.mrb[2].mxu1 }
  0xee   :  { %v2423_v44 = vpop.f32.mrb[3].mxu1  ;;  %v2763_v54 = vadd.f32 %v224_v43, %v29_v53  ;;  %v714_v43 = vand.u32 4294901760, %v713_v38 }
  0xef   :  { %v596_v44 = vpop.permute.xlu1 %595 }
  0xf1   :  { %v230_v45 = vpop.f32.mrb[4].mxu1 }
  0xf2   :  { %v2426_v46 = vpop.f32.mrb[5].mxu1  ;;  %v2765_v61 = vadd.f32 %v230_v45, %v34_v60 }
  0xf3   :  { %v606_v56 = vpop.permute.xlu1 %605 }
 0x10d   :  { %v566_v49 = vpop.f32.mrb[0].mxu0 }
 0x10e   :  { %v2762_v50 = vadd.f32 %v566_v49, %v123_v48  ;;  %v2464_v51 = vpop.f32.mrb[1].mxu0  ;;  %v2277_v48 = vld [vmem:[%s3273_s1 + $0x30] sm:$0xff]  ;;  %v601_v49 = vpop.permute.xlu0 %600 }
 0x10f   :  { %v1207_v51 = vsel %vm608_vm3, %v2277_v48, 0 }
 0x110   :  { %2874 = vtanh.f32 %v2762_v50 }
 0x111   :  { %v572_v55 = vpop.f32.mrb[2].mxu0 }
 0x112   :  { %v2764_v57 = vadd.f32 %v2763_v54, %v572_v55  ;;  %v2467_v58 = vpop.f32.mrb[3].mxu0  ;;  %v2278_v54 = vld [vmem:[%s3273_s1 + $0x38] sm:$0xff]  ;;  %v3144_v55 = vand.u32 4294901760, %v1207_v51 }
 0x113   :  { %v1210_v58 = vsel %vm608_vm3, %v2278_v54, 0 }
 0x114   :  { %2876 = vtanh.f32 %v2764_v57 }
 0x115   :  { %v578_v63 = vpop.f32.mrb[4].mxu0 }
 0x116   :  { %v2766_v2 = vadd.f32 %v2765_v61, %v578_v63  ;;  %v2470_v3 = vpop.f32.mrb[5].mxu0  ;;  %v2279_v61 = vld [vmem:[%s3273_s1 + $0x40] sm:$0xf]  ;;  %v3153_v63 = vand.u32 4294901760, %v1210_v58 }
 0x117   :  { %v1213_v1 = vsel %vm608_vm3, %v2279_v61, 0 }
 0x118   :  { %2878 = vtanh.f32 %v2766_v2 }
 0x11a   :  { %v2875_v8 = vpop.eup %2874 }
 0x11b   :  { %v623_v9 = vand.u32 4294901760, %v2875_v8 }
 0x11d   :  { %v722_v13 = vsub.f32 %v2875_v8, %v623_v9 }
 0x11e   :  { %v2877_v14 = vpop.eup %2876 }
 0x11f   :  { %v626_v15 = vand.u32 4294901760, %v2877_v14  ;;  %v723_v16 = vand.u32 4294901760, %v722_v13 }
 0x121   :  { %v3066_v20 = vpack.c.bf16 %v626_v15, %v623_v9  ;;  %v729_v21 = vsub.f32 %v2877_v14, %v626_v15  ;;  %v724_v24 = vsub.f32 %v722_v13, %v723_v16 }
 0x122   :  { %v2879_v22 = vpop.eup %2878 }
 0x123   :  { %2707 = vmatpush3.bf16.msra.mxu1 %v3066_v20  ;;  %v620_v23 = vsel %vm618_vm4, %v2879_v22, 0  ;;  %v730_v25 = vand.u32 4294901760, %v729_v21  ;;  %v2712_v26 = vpack.c.bf16 %v729_v21, %v722_v13  ;;  %v725_v34 = vand.u32 4294901760, %v724_v24 }
 0x124   :  { %2475 = vmatprep.subr.mxu1 %v2892_v0  ;;  %v629_v27 = vand.u32 4294901760, %v620_v23 }
 0x125   :  { %v731_v31 = vsub.f32 %v729_v21, %v730_v25  ;;  %v2718_v32 = vpack.c.bf16 %v730_v25, %v723_v16 }
 0x126   :  { %v736_v33 = vsub.f32 %v620_v23, %v629_v27 }
 0x127   :  { %2476 = vmatpush3.msra.mxu1 %v629_v27  ;;  %v732_v35 = vand.u32 4294901760, %v731_v31 }
 0x128   :  { %2478 = vmatmul.mubr.f32.vlgmr.msra.gmra.mrb[6].mxu1 %v694_v28  ;;  %2708 = vmatprep.subr.bf16.mxu1 %v2895_v40  ;;  %v737_v37 = vand.u32 4294901760, %v736_v33 }
 0x129   :  { %2480 = vmatprep.mubr.msk.f32.mxu1 %vm2893_vm2, %v2892_v0  ;;  %v2709_v39 = vpack.c.bf16 %v732_v35, %v725_v34 }
 0x12a   :  { %v738_v41 = vsub.f32 %v736_v33, %v737_v37 }
 0x12b   :  { %2710 = vmatpush3.bf16.msra.mxu1 %v2709_v39 }
 0x12c   :  { %2481 = vmatmul.mubr.f32.gmra.mrb[8].mxu1 %v704_v36  ;;  %2490 = vmatprep.subr.mxu1 %v2892_v0  ;;  %v739_v42 = vand.u32 4294901760, %v738_v41 }
 0x12d   :  { %2483 = vmatprep.mubr.msk.f32.mxu1 %vm2893_vm2, %v2892_v0 }
 0x12f   :  { %2491 = vmatpush3.msra.mxu1 %v739_v42  ;;  %v2283_v42 = vld [vmem:[%s3273_s1 + $0x48] sm:$0x1] }
 0x130   :  { %2484 = vmatmul.mubr.f32.gmra.mrb[10].mxu1 %v714_v43  ;;  %2711 = vmatprep.subr.bf16.mxu1 %v2895_v40  ;;  %v1199_v43 = vpop.permute.xlu1 %1198 }
 0x131   :  { %2492 = vmatprep.mubr.msk.f32.mxu1 %vm2893_vm2, %v2892_v0 }
 0x134   :  { %2493 = vmatmul.mubr.f32.vlgmr.msra.gmra.mrb[6].mxu1 %v3041_v62 }
 0x135   :  { %2713 = vmatpush3.bf16.msra.mxu1 %v2712_v26  ;;  %2495 = vmatprep.mubr.msk.f32.mxu1 %vm2893_vm2, %v2892_v0 }
 0x136   :  { %2505 = vmatprep.subr.mxu1 %v2892_v0 }
 0x138   :  { %2496 = vmatmul.mubr.f32.gmra.mrb[8].mxu1 %v3050_v6 }
 0x139   :  { %2506 = vmatpush3.msra.mxu1 %v736_v33  ;;  %2498 = vmatprep.mubr.msk.f32.mxu1 %vm2893_vm2, %v2892_v0 }
 0x13a   :  { %2714 = vmatprep.subr.bf16.mxu1 %v2895_v40 }
 0x13c   :  { %2499 = vmatmul.mubr.f32.gmra.mrb[10].mxu1 %v3057_v12 }
 0x13d   :  { %2507 = vmatprep.mubr.msk.f32.mxu1 %vm2893_vm2, %v2892_v0 }
 0x140   :  { %2508 = vmatmul.mubr.f32.vlgmr.msra.gmra.mrb[6].mxu1 %v3048_v5  ;;  %v3158_v5 = vsub.f32 %v1210_v58, %v3153_v63 }
 0x141   :  { %2716 = vmatpush3.bf16.msra.mxu1 %v3066_v20  ;;  %2510 = vmatprep.mubr.msk.f32.mxu1 %vm2893_vm2, %v2892_v0 }
 0x142   :  { %2520 = vmatprep.subr.mxu1 %v2892_v0 }
 0x144   :  { %2511 = vmatmul.mubr.f32.gmra.mrb[8].mxu1 %v3055_v11 }
 0x145   :  { %2521 = vmatpush3.msra.mxu1 %v629_v27  ;;  %2513 = vmatprep.mubr.msk.f32.mxu1 %vm2893_vm2, %v2892_v0 }
 0x146   :  { %2717 = vmatprep.subr.bf16.mxu1 %v2895_v40 }
 0x148   :  { %2514 = vmatmul.mubr.f32.gmra.mrb[10].mxu1 %v3064_v19 }
 0x149   :  { %2522 = vmatprep.mubr.msk.f32.mxu1 %vm2893_vm2, %v2892_v0 }
 0x14c   :  { %2523 = vmatmul.mubr.f32.vlgmr.msra.gmra.mrb[6].mxu1 %v692_v10 }
 0x14d   :  { %2719 = vmatpush3.bf16.msra.mxu1 %v2718_v32  ;;  %2525 = vmatprep.mubr.msk.f32.mxu1 %vm2893_vm2, %v2892_v0 }
 0x14e   :  { %2535 = vmatprep.subr.mxu1 %v2892_v0 }
 0x150   :  { %2526 = vmatmul.mubr.f32.gmra.mrb[8].mxu1 %v702_v18 }
 0x151   :  { %2536 = vmatpush3.msra.mxu1 %v737_v37  ;;  %2528 = vmatprep.mubr.msk.f32.mxu1 %vm2893_vm2, %v2892_v0  ;;  %v1194_v37 = vpop.permute.xlu0 %1193 }
 0x152   :  { %2720 = vmatprep.subr.bf16.mxu1 %v2895_v40 }
 0x154   :  { %2529 = vmatmul.mubr.f32.gmra.mrb[10].mxu1 %v712_v30 }
 0x155   :  { %2537 = vmatprep.mubr.msk.f32.mxu1 %vm2893_vm2, %v2892_v0 }
 0x158   :  { %2538 = vmatmul.mubr.f32.vlgmr.msra.gmra.mrb[6].mxu1 %v3041_v62 }
 0x159   :  { %2722 = vmatpush3.bf16.msra.mxu1 %v3066_v20  ;;  %2540 = vmatprep.mubr.msk.f32.mxu1 %vm2893_vm2, %v2892_v0 }
 0x15a   :  { %2550 = vmatprep.subr.mxu1 %v2892_v0 }
 0x15c   :  { %2541 = vmatmul.mubr.f32.gmra.mrb[8].mxu1 %v3050_v6 }
 0x15d   :  { %2551 = vmatpush3.msra.mxu1 %v629_v27  ;;  %2543 = vmatprep.mubr.msk.f32.mxu1 %vm2893_vm2, %v2892_v0 }
 0x15e   :  { %2741 = vmatprep.subr.bf16.mxu1 %v2895_v40 }
 0x160   :  { %2544 = vmatmul.mubr.f32.gmra.mrb[10].mxu1 %v3057_v12 }
 0x161   :  { %2552 = vmatprep.mubr.msk.f32.mxu1 %vm2893_vm2, %v2892_v0 }
 0x164   :  { %2553 = vmatmul.mubr.f32.vlgmr.msra.gmra.mrb[6].mxu1 %v3041_v62  ;;  %v3151_v62 = vsub.f32 %v1207_v51, %v3144_v55 }
 0x165   :  { %2555 = vmatprep.mubr.msk.f32.mxu1 %vm2893_vm2, %v2892_v0 }
 0x166   :  { %v1288_v4 = vand.u32 4294901760, %v3151_v62 }
 0x168   :  { %2556 = vmatmul.mubr.f32.gmra.mrb[8].mxu1 %v3050_v6  ;;  %v3160_v6 = vand.u32 4294901760, %v1213_v1  ;;  %v1289_v11 = vsub.f32 %v3151_v62, %v1288_v4 }
 0x169   :  { %2558 = vmatprep.mubr.msk.f32.mxu1 %vm2893_vm2, %v2892_v0 }
 0x16a   :  { %v3167_v13 = vsub.f32 %v1213_v1, %v3160_v6  ;;  %v1290_v22 = vand.u32 4294901760, %v1289_v11 }
 0x16c   :  { %2559 = vmatmul.mubr.f32.gmra.mrb[10].mxu1 %v3057_v12  ;;  %v1298_v12 = vand.u32 4294901760, %v3158_v5  ;;  %v1308_v24 = vand.u32 4294901760, %v3167_v13 }
 0x16d   :  { %2657 = vmatprep.mubr.msk.f32.mxu1 %vm2893_vm2, %v2892_v0 }
 0x16e   :  { %v1299_v23 = vsub.f32 %v3158_v5, %v1298_v12  ;;  %v1309_v32 = vsub.f32 %v3167_v13, %v1308_v24 }
 0x170   :  { %v1300_v30 = vand.u32 4294901760, %v1299_v23  ;;  %v1310_v36 = vand.u32 4294901760, %v1309_v32 }
 0x237   :  { %v1164_v45 = vpop.f32.mrb[6].mxu1 }
 0x238   :  { %v2767_v46 = vadd.f32 %v1164_v45, %v596_v44  ;;  %v2554_v47 = vpop.f32.mrb[7].mxu1  ;;  %v1789_v45 = vsel %vm608_vm3, %v2283_v42, 0 }
 0x239   :  { %v3241_v48 = vand.u32 4294901760, %v1789_v45 }
 0x23a   :  { %2880 = vtanh.f32 %v2767_v46 }
 0x23b   :  { %v1170_v50 = vpop.f32.mrb[8].mxu1 }
 0x23c   :  { %v2768_v52 = vadd.f32 %v1170_v50, %v601_v49  ;;  %v2557_v53 = vpop.f32.mrb[9].mxu1  ;;  %v1204_v49 = vpop.permute.xlu0 %1203 }
 0x23d   :  { %v1863_v53 = vsub.f32 %v1789_v45, %v3241_v48 }
 0x23e   :  { %2882 = vtanh.f32 %v2768_v52 }
 0x23f   :  { %v1176_v57 = vpop.f32.mrb[10].mxu1 }
 0x240   :  { %v2769_v59 = vadd.f32 %v1176_v57, %v606_v56  ;;  %v2560_v60 = vpop.f32.mrb[11].mxu1  ;;  %v1864_v56 = vand.u32 4294901760, %v1863_v53 }
 0x242   :  { %2884 = vtanh.f32 %v2769_v59  ;;  %v1865_v61 = vsub.f32 %v1863_v53, %v1864_v56 }
 0x244   :  { %v2881_v2 = vpop.eup %2880 }
 0x245   :  { %v1219_v3 = vand.u32 4294901760, %v2881_v2 }
 0x247   :  { %v1318_v7 = vsub.f32 %v2881_v2, %v1219_v3 }
 0x248   :  { %v2883_v8 = vpop.eup %2882 }
 0x249   :  { %v1222_v9 = vand.u32 4294901760, %v2883_v8  ;;  %v1319_v10 = vand.u32 4294901760, %v1318_v7 }
 0x24b   :  { %v3169_v14 = vpack.c.bf16 %v1222_v9, %v1219_v3  ;;  %v1325_v15 = vsub.f32 %v2883_v8, %v1222_v9  ;;  %v1320_v18 = vsub.f32 %v1318_v7, %v1319_v10 }
 0x24c   :  { %v2885_v16 = vpop.eup %2884 }
 0x24d   :  { %2725 = vmatpush3.bf16.msra.mxu0 %v3169_v14  ;;  %v1216_v17 = vsel %vm618_vm4, %v2885_v16, 0  ;;  %v1326_v19 = vand.u32 4294901760, %v1325_v15  ;;  %v2730_v20 = vpack.c.bf16 %v1325_v15, %v1318_v7  ;;  %v1321_v28 = vand.u32 4294901760, %v1320_v18 }
 0x24e   :  { %2565 = vmatprep.subr.mxu0 %v2892_v0  ;;  %v1225_v21 = vand.u32 4294901760, %v1216_v17  ;;  %v1866_v7 = vand.u32 4294901760, %v1865_v61 }
 0x24f   :  { %v1327_v25 = vsub.f32 %v1325_v15, %v1326_v19  ;;  %v2736_v26 = vpack.c.bf16 %v1326_v19, %v1319_v10 }
 0x250   :  { %v1332_v27 = vsub.f32 %v1216_v17, %v1225_v21  ;;  %v1786_v17 = vpop.permute.xlu1 %1785 }
 0x251   :  { %2566 = vmatpush3.msra.mxu0 %v1225_v21  ;;  %v1328_v29 = vand.u32 4294901760, %v1327_v25 }
 0x252   :  { %2568 = vmatmul.mubr.f32.vlgmr.msra.gmra.mrb[6].mxu0 %v1290_v22  ;;  %2726 = vmatprep.subr.bf16.mxu0 %v2895_v40  ;;  %v1333_v31 = vand.u32 4294901760, %v1332_v27 }
 0x253   :  { %2570 = vmatprep.mubr.msk.f32.mxu0 %vm2893_vm2, %v2892_v0  ;;  %v2727_v33 = vpack.c.bf16 %v1328_v29, %v1321_v28 }
 0x254   :  { %v1334_v34 = vsub.f32 %v1332_v27, %v1333_v31 }
 0x255   :  { %2728 = vmatpush3.bf16.msra.mxu0 %v2727_v33 }
 0x256   :  { %2571 = vmatmul.mubr.f32.gmra.mrb[8].mxu0 %v1300_v30  ;;  %2580 = vmatprep.subr.mxu0 %v2892_v0  ;;  %v1335_v35 = vand.u32 4294901760, %v1334_v34 }
 0x257   :  { %2573 = vmatprep.mubr.msk.f32.mxu0 %vm2893_vm2, %v2892_v0 }
 0x259   :  { %2581 = vmatpush3.msra.mxu0 %v1335_v35 }
 0x25a   :  { %2574 = vmatmul.mubr.f32.gmra.mrb[10].mxu0 %v1310_v36  ;;  %2729 = vmatprep.subr.bf16.mxu0 %v2895_v40 }
 0x25b   :  { %2582 = vmatprep.mubr.msk.f32.mxu0 %vm2893_vm2, %v2892_v0 }
 0x25e   :  { %2583 = vmatmul.mubr.f32.vlgmr.msra.gmra.mrb[6].mxu0 %v3144_v55 }
 0x25f   :  { %2731 = vmatpush3.bf16.msra.mxu0 %v2730_v20  ;;  %2585 = vmatprep.mubr.msk.f32.mxu0 %vm2893_vm2, %v2892_v0 }
 0x260   :  { %2595 = vmatprep.subr.mxu0 %v2892_v0 }
 0x262   :  { %2586 = vmatmul.mubr.f32.gmra.mrb[8].mxu0 %v3153_v63 }
 0x263   :  { %2596 = vmatpush3.msra.mxu0 %v1332_v27  ;;  %2588 = vmatprep.mubr.msk.f32.mxu0 %vm2893_vm2, %v2892_v0 }
 0x264   :  { %2732 = vmatprep.subr.bf16.mxu0 %v2895_v40 }
 0x266   :  { %2589 = vmatmul.mubr.f32.gmra.mrb[10].mxu0 %v3160_v6 }
 0x267   :  { %2597 = vmatprep.mubr.msk.f32.mxu0 %vm2893_vm2, %v2892_v0 }
 0x26a   :  { %2598 = vmatmul.mubr.f32.vlgmr.msra.gmra.mrb[6].mxu0 %v3151_v62 }
 0x26b   :  { %2734 = vmatpush3.bf16.msra.mxu0 %v3169_v14  ;;  %2600 = vmatprep.mubr.msk.f32.mxu0 %vm2893_vm2, %v2892_v0 }
 0x26c   :  { %2610 = vmatprep.subr.mxu0 %v2892_v0 }
 0x26e   :  { %2601 = vmatmul.mubr.f32.gmra.mrb[8].mxu0 %v3158_v5 }
 0x26f   :  { %2611 = vmatpush3.msra.mxu0 %v1225_v21  ;;  %2603 = vmatprep.mubr.msk.f32.mxu0 %vm2893_vm2, %v2892_v0 }
 0x270   :  { %2735 = vmatprep.subr.bf16.mxu0 %v2895_v40 }
 0x272   :  { %2604 = vmatmul.mubr.f32.gmra.mrb[10].mxu0 %v3167_v13 }
 0x273   :  { %2612 = vmatprep.mubr.msk.f32.mxu0 %vm2893_vm2, %v2892_v0 }
 0x276   :  { %2613 = vmatmul.mubr.f32.vlgmr.msra.gmra.mrb[6].mxu0 %v1288_v4 }
 0x277   :  { %2737 = vmatpush3.bf16.msra.mxu0 %v2736_v26  ;;  %2615 = vmatprep.mubr.msk.f32.mxu0 %vm2893_vm2, %v2892_v0 }
 0x278   :  { %2625 = vmatprep.subr.mxu0 %v2892_v0 }
 0x27a   :  { %2616 = vmatmul.mubr.f32.gmra.mrb[8].mxu0 %v1298_v12 }
 0x27b   :  { %2626 = vmatpush3.msra.mxu0 %v1333_v31  ;;  %2618 = vmatprep.mubr.msk.f32.mxu0 %vm2893_vm2, %v2892_v0 }
 0x27c   :  { %2738 = vmatprep.subr.bf16.mxu0 %v2895_v40 }
 0x27e   :  { %2619 = vmatmul.mubr.f32.gmra.mrb[10].mxu0 %v1308_v24 }
 0x27f   :  { %2627 = vmatprep.mubr.msk.f32.mxu0 %vm2893_vm2, %v2892_v0 }
 0x282   :  { %2628 = vmatmul.mubr.f32.vlgmr.msra.gmra.mrb[6].mxu0 %v3144_v55 }
 0x283   :  { %2740 = vmatpush3.bf16.msra.mxu0 %v3169_v14  ;;  %2630 = vmatprep.mubr.msk.f32.mxu0 %vm2893_vm2, %v2892_v0 }
 0x284   :  { %2640 = vmatprep.subr.mxu0 %v2892_v0 }
 0x286   :  { %2631 = vmatmul.mubr.f32.gmra.mrb[8].mxu0 %v3153_v63 }
 0x287   :  { %2641 = vmatpush3.msra.mxu0 %v1225_v21  ;;  %2633 = vmatprep.mubr.msk.f32.mxu0 %vm2893_vm2, %v2892_v0 }
 0x28a   :  { %2634 = vmatmul.mubr.f32.gmra.mrb[10].mxu0 %v3160_v6 }
 0x28b   :  { %2642 = vmatprep.mubr.msk.f32.mxu0 %vm2893_vm2, %v2892_v0 }
 0x28e   :  { %2643 = vmatmul.mubr.f32.vlgmr.msra.gmra.mrb[6].mxu0 %v3144_v55 }
 0x28f   :  { %2645 = vmatprep.mubr.msk.f32.mxu0 %vm2893_vm2, %v2892_v0 }
 0x292   :  { %2646 = vmatmul.mubr.f32.gmra.mrb[8].mxu0 %v3153_v63 }
 0x293   :  { %2648 = vmatprep.mubr.msk.f32.mxu0 %vm2893_vm2, %v2892_v0 }
 0x296   :  { %2649 = vmatmul.mubr.f32.gmra.mrb[10].mxu0 %v3160_v6 }
 0x361   :  { %v1760_v38 = vpop.f32.mrb[6].mxu0 }
 0x362   :  { %v2770_v39 = vadd.f32 %v1760_v38, %v1194_v37  ;;  %v2644_v41 = vpop.f32.mrb[7].mxu0 }
 0x364   :  { %2886 = vtanh.f32 %v2770_v39 }
 0x365   :  { %v1766_v44 = vpop.f32.mrb[8].mxu0 }
 0x366   :  { %v2771_v46 = vadd.f32 %v1766_v44, %v1199_v43  ;;  %v2647_v47 = vpop.f32.mrb[9].mxu0 }
 0x368   :  { %2888 = vtanh.f32 %v2771_v46 }
 0x369   :  { %v1772_v50 = vpop.f32.mrb[10].mxu0 }
 0x36a   :  { %v2772_v51 = vadd.f32 %v1772_v50, %v1204_v49  ;;  %v2650_v52 = vpop.f32.mrb[11].mxu0 }
 0x36c   :  { %2890 = vtanh.f32 %v2772_v51 }
 0x36e   :  { %v2887_v54 = vpop.eup %2886 }
 0x36f   :  { %v1795_v55 = vand.u32 4294901760, %v2887_v54 }
 0x371   :  { %v1874_v57 = vsub.f32 %v2887_v54, %v1795_v55 }
 0x372   :  { %v2889_v58 = vpop.eup %2888 }
 0x373   :  { %v1798_v59 = vand.u32 4294901760, %v2889_v58  ;;  %v1875_v60 = vand.u32 4294901760, %v1874_v57 }
 0x375   :  { %v2742_v62 = vpack.c.bf16 %v1798_v59, %v1795_v55  ;;  %v1881_v63 = vsub.f32 %v2889_v58, %v1798_v59  ;;  %v1876_v3 = vsub.f32 %v1874_v57, %v1875_v60 }
 0x376   :  { %v2891_v1 = vpop.eup %2890 }
 0x377   :  { %2743 = vmatpush3.bf16.msra.mxu1 %v2742_v62  ;;  %v1792_v2 = vsel %vm618_vm4, %v2891_v1, 0  ;;  %v1882_v4 = vand.u32 4294901760, %v1881_v63  ;;  %v2748_v5 = vpack.c.bf16 %v1881_v63, %v1874_v57  ;;  %v1877_v11 = vand.u32 4294901760, %v1876_v3 }
 0x378   :  { %2655 = vmatprep.subr.mxu1 %v2892_v0  ;;  %v1801_v6 = vand.u32 4294901760, %v1792_v2 }
 0x379   :  { %v1883_v8 = vsub.f32 %v1881_v63, %v1882_v4  ;;  %v2754_v9 = vpack.c.bf16 %v1882_v4, %v1875_v60 }
 0x37a   :  { %v1888_v10 = vsub.f32 %v1792_v2, %v1801_v6 }
 0x37b   :  { %2656 = vmatpush3.msra.mxu1 %v1801_v6  ;;  %v1884_v12 = vand.u32 4294901760, %v1883_v8 }
 0x37c   :  { %2658 = vmatmul.mubr.f32.vlgmr.msra.gmra.mrb[12].mxu1 %v1866_v7  ;;  %2744 = vmatprep.subr.bf16.mxu1 %v2895_v40  ;;  %v1889_v13 = vand.u32 4294901760, %v1888_v10 }
 0x37d   :  { %v2745_v14 = vpack.c.bf16 %v1884_v12, %v1877_v11  ;;  %2666 = vmatprep.mubr.msk.f32.mxu1 %vm2893_vm2, %v2892_v0 }
 0x37e   :  { %v1890_v15 = vsub.f32 %v1888_v10, %v1889_v13 }
 0x37f   :  { %2746 = vmatpush3.bf16.msra.mxu1 %v2745_v14 }
 0x380   :  { %2664 = vmatprep.subr.mxu1 %v2892_v0  ;;  %v1891_v16 = vand.u32 4294901760, %v1890_v15 }
 0x383   :  { %2665 = vmatpush3.msra.mxu1 %v1891_v16 }
 0x384   :  { %2667 = vmatmul.mubr.f32.vlgmr.msra.gmra.mrb[12].mxu1 %v3241_v48  ;;  %2747 = vmatprep.subr.bf16.mxu1 %v2895_v40 }
 0x385   :  { %2749 = vmatpush3.bf16.msra.mxu1 %v2748_v5  ;;  %2675 = vmatprep.mubr.msk.f32.mxu1 %vm2893_vm2, %v2892_v0 }
 0x386   :  { %2673 = vmatprep.subr.mxu1 %v2892_v0 }
 0x389   :  { %2674 = vmatpush3.msra.mxu1 %v1888_v10 }
 0x38a   :  { %2750 = vmatprep.subr.bf16.mxu1 %v2895_v40 }
 0x38c   :  { %2676 = vmatmul.mubr.f32.vlgmr.msra.gmra.mrb[12].mxu1 %v1863_v53 }
 0x38d   :  { %2752 = vmatpush3.bf16.msra.mxu1 %v2742_v62  ;;  %2684 = vmatprep.mubr.msk.f32.mxu1 %vm2893_vm2, %v2892_v0 }
 0x38e   :  { %2682 = vmatprep.subr.mxu1 %v2892_v0 }
 0x391   :  { %2683 = vmatpush3.msra.mxu1 %v1801_v6 }
 0x392   :  { %2753 = vmatprep.subr.bf16.mxu1 %v2895_v40 }
 0x394   :  { %2685 = vmatmul.mubr.f32.vlgmr.msra.gmra.mrb[12].mxu1 %v1864_v56 }
 0x395   :  { %2755 = vmatpush3.bf16.msra.mxu1 %v2754_v9  ;;  %2693 = vmatprep.mubr.msk.f32.mxu1 %vm2893_vm2, %v2892_v0 }
 0x396   :  { %2691 = vmatprep.subr.mxu1 %v2892_v0 }
 0x399   :  { %2692 = vmatpush3.msra.mxu1 %v1889_v13 }
 0x39a   :  { %2756 = vmatprep.subr.bf16.mxu1 %v2895_v40 }
 0x39c   :  { %2694 = vmatmul.mubr.f32.vlgmr.msra.gmra.mrb[12].mxu1 %v3241_v48 }
 0x39d   :  { %2758 = vmatpush3.bf16.msra.mxu1 %v2742_v62  ;;  %2702 = vmatprep.mubr.msk.f32.mxu1 %vm2893_vm2, %v2892_v0 }
 0x39e   :  { %2700 = vmatprep.subr.mxu1 %v2892_v0 }
 0x3a1   :  { %2701 = vmatpush3.msra.mxu1 %v1801_v6 }
 0x3a4   :  { %2703 = vmatmul.mubr.f32.vlgmr.msra.gmra.mrb[12].mxu1 %v3241_v48 }
 0x477   :  { %v2262_v18 = vpop.f32.mrb[12].mxu1 }
 0x478   :  { %v2773_v19 = vadd.f32 %v2262_v18, %v1786_v17  ;;  %v2704_v20 = vpop.f32.mrb[13].mxu1 }
 0x47a   :  { %2266 = vst [vmem:[%s3275_s3] sm:$0x1] %v2773_v19 }

</bundles_post_ra>
